<compile_context>
chip_gen: v5e
topology: v5e:2x2
jax: 0.10.0
libtpu: 0.0.40
codegen_flags: <defaults>
</compile_context>

<pallas_src>
import jax
import jax.numpy as jnp
from jax.experimental import pallas as pl
from jax.experimental.pallas import tpu as pltpu


def _rebn_kernel(x_ref, gamma_ref, beta_ref, o_ref):
    """x_ref/o_ref: (N, c_blk, HW); gamma_ref/beta_ref: (c_blk, 1)."""
    x = x_ref[...].astype(jnp.float32)                # (N, Cb, HW)
    n, cb, hw = x.shape
    inv_m = jnp.float32(1.0 / (n * hw))               # static scalar, no vector divide

    # One-pass per-channel moments (no full-size `centered` temporary).
    s = jnp.sum(x, axis=(0, 2), keepdims=True)        # (1, Cb, 1)
    sq = jnp.sum(x * x, axis=(0, 2), keepdims=True)   # (1, Cb, 1)
    mean = s * inv_m
    var = sq * inv_m - mean * mean                    # biased var (training-mode BN)
    inv_std = jax.lax.rsqrt(var + jnp.float32(1e-5))  # EUP rsqrt

    gamma = gamma_ref[...].reshape(1, cb, 1)
    beta = beta_ref[...].reshape(1, cb, 1)
    scale = gamma * inv_std                           # (1, Cb, 1)
    shift = beta - mean * scale                       # (1, Cb, 1)

    y = x * scale + shift                             # normalize + affine, fused
    o_ref[...] = jnp.maximum(y, jnp.float32(0.0)).astype(o_ref.dtype)


def _choose_c_block(n, c, hw, itemsize, buf_budget_bytes=4 * 1024 * 1024):
    """Channel-block size for (N, c_blk, HW) slabs.

    Rules:
      * second-to-last block dim must be a multiple of the sublane tile
        (8 for f32, 16 for bf16, 32 for int8) or equal the full channel dim;
      * one slab stays within `buf_budget_bytes` so ~4 double-buffered slabs
        (in + out) fit comfortably even in v7x's 64 MiB VMEM;
      * with larger C, cap the block so the grid has >= ~8 steps so the DMA
        pipeline overlaps compute.
    """
    sub = max(8, 32 // max(1, itemsize))
    if c <= sub:
        return c                                       # block == full channel dim
    per_channel = max(1, n * hw * itemsize)
    fit = (buf_budget_bytes // per_channel) // sub * sub
    if fit < sub:
        # TODO(synk): a single-channel slab exceeds the VMEM budget; such shapes
        # would need a two-pass, row-tiled stats kernel.
        fit = sub
    steps_cap = max(sub, (c // 8) // sub * sub)        # aim for >= ~8 grid steps
    return max(sub, min(fit, steps_cap, (c // sub) * sub))


def rebn_forward(x_nchw, gamma, beta):
    """x_nchw: (N, C, H, W); gamma, beta: (C,). Returns (N, C, H, W)."""
    n, c, h, w = x_nchw.shape
    hw = h * w
    itemsize = jnp.dtype(x_nchw.dtype).itemsize

    x3d = x_nchw.reshape(n, c, hw)                     # free reshape, stays NCHW
    g2d = gamma.reshape(c, 1).astype(jnp.float32)
    b2d = beta.reshape(c, 1).astype(jnp.float32)

    c_blk = _choose_c_block(n, c, hw, itemsize)
    grid = (pl.cdiv(c, c_blk),)

    out3d = pl.pallas_call(
        _rebn_kernel,
        out_shape=jax.ShapeDtypeStruct((n, c, hw), x_nchw.dtype),
        grid=grid,
        in_specs=[
            pl.BlockSpec((n, c_blk, hw), lambda i: (0, i, 0)),
            pl.BlockSpec((c_blk, 1), lambda i: (i, 0)),
            pl.BlockSpec((c_blk, 1), lambda i: (i, 0)),
        ],
        out_specs=pl.BlockSpec((n, c_blk, hw), lambda i: (0, i, 0)),
        compiler_params=pltpu.CompilerParams(
            dimension_semantics=("parallel",),         # shard channel blocks across TCs
            vmem_limit_bytes=48 * 1024 * 1024,         # headroom; safe on v7x (64 MiB)
        ),
    )(x3d, g2d, b2d)

    return out3d.reshape(n, c, h, w)


def rebn_reference(x_nchw, gamma, beta, eps=1e-5):
    """Pure-JAX reference of training-mode BatchNorm2d + ReLU (NCHW)."""
    mean = jnp.mean(x_nchw, axis=(0, 2, 3), keepdims=True)
    var = jnp.mean((x_nchw - mean) ** 2, axis=(0, 2, 3), keepdims=True)
    g = gamma.reshape(1, -1, 1, 1)
    b = beta.reshape(1, -1, 1, 1)
    y = (x_nchw - mean) * jax.lax.rsqrt(var + eps) * g + b
    return jnp.maximum(y, 0.0)


if __name__ == "__main__":
    key = jax.random.PRNGKey(0)
    N, C, H, W = 2, 4, 16, 16     # small NCHW input, in_ch = 4

    kx, _ = jax.random.split(key)
    x = jax.random.normal(kx, (N, C, H, W), dtype=jnp.float32)

    # BatchNorm2d parameters: weight (C,), bias (C,).  PyTorch default init is
    # weight=1, bias=0; perturb deterministically so the affine path is exercised.
    gamma = jnp.ones((C,), jnp.float32) + 0.1 * jnp.arange(C, dtype=jnp.float32)
    beta = 0.05 * jnp.arange(C, dtype=jnp.float32)

    out = jax.block_until_ready(rebn_forward(x, gamma, beta))
    ref = rebn_reference(x, gamma, beta)

    assert out.shape == (N, C, H, W)
    assert jnp.allclose(out, ref, atol=2e-5, rtol=1e-5), "mismatch vs reference"

    print("KERNEL_OK")
</pallas_src>

<mosaic_0001>
module attributes {stable_mosaic.version = 11 : i64} {
  func.func @_rebn_kernel(%arg0: i32, %arg1: memref<2x4x256xf32, #tpu.memory_space<vmem>>, %arg2: memref<4x1xf32, #tpu.memory_space<vmem>>, %arg3: memref<4x1xf32, #tpu.memory_space<vmem>>, %arg4: memref<2x4x256xf32, #tpu.memory_space<vmem>>) attributes {dimension_semantics = [#tpu.dimension_semantics<parallel>], iteration_bounds = array<i64: 1>, scalar_prefetch = 0 : i64, scratch_operands = 0 : i64, tpu.core_type = #tpu.core_type<tc>, window_params = [{transform_indices = @transform_0, window_bounds = array<i64: 2, 4, 256>}, {transform_indices = @transform_1, window_bounds = array<i64: 4, 1>}, {transform_indices = @transform_2, window_bounds = array<i64: 4, 1>}, {transform_indices = @transform_3, window_bounds = array<i64: 2, 4, 256>}]} {
    %c0 = arith.constant 0 : index
    %c0_0 = arith.constant 0 : index
    %c0_1 = arith.constant 0 : index
    %0 = vector.load %arg1[%c0, %c0_0, %c0_1] : memref<2x4x256xf32, #tpu.memory_space<vmem>>, vector<2x4x256xf32>
    %cst = arith.constant dense<0.000000e+00> : vector<4xf32>
    %1 = vector.multi_reduction <add>, %0, %cst [0, 2] : vector<2x4x256xf32> to vector<4xf32>
    %2 = vector.shape_cast %1 : vector<4xf32> to vector<1x4x1xf32>
    %3 = arith.mulf %0, %0 : vector<2x4x256xf32>
    %cst_2 = arith.constant dense<0.000000e+00> : vector<4xf32>
    %4 = vector.multi_reduction <add>, %3, %cst_2 [0, 2] : vector<2x4x256xf32> to vector<4xf32>
    %5 = vector.shape_cast %4 : vector<4xf32> to vector<1x4x1xf32>
    %cst_3 = arith.constant 0.001953125 : f32
    %6 = vector.broadcast %cst_3 : f32 to vector<1x4x1xf32>
    %7 = arith.mulf %2, %6 : vector<1x4x1xf32>
    %cst_4 = arith.constant 0.001953125 : f32
    %8 = vector.broadcast %cst_4 : f32 to vector<1x4x1xf32>
    %9 = arith.mulf %5, %8 : vector<1x4x1xf32>
    %10 = arith.mulf %7, %7 : vector<1x4x1xf32>
    %11 = arith.subf %9, %10 : vector<1x4x1xf32>
    %cst_5 = arith.constant 9.99999974E-6 : f32
    %12 = vector.broadcast %cst_5 : f32 to vector<1x4x1xf32>
    %13 = arith.addf %11, %12 : vector<1x4x1xf32>
    %14 = math.rsqrt %13 : vector<1x4x1xf32>
    %c0_6 = arith.constant 0 : index
    %c0_7 = arith.constant 0 : index
    %15 = vector.load %arg2[%c0_6, %c0_7] : memref<4x1xf32, #tpu.memory_space<vmem>>, vector<4x1xf32>
    %16 = vector.shape_cast %15 : vector<4x1xf32> to vector<1x4x1xf32>
    %c0_8 = arith.constant 0 : index
    %c0_9 = arith.constant 0 : index
    %17 = vector.load %arg3[%c0_8, %c0_9] : memref<4x1xf32, #tpu.memory_space<vmem>>, vector<4x1xf32>
    %18 = vector.shape_cast %17 : vector<4x1xf32> to vector<1x4x1xf32>
    %19 = arith.mulf %16, %14 : vector<1x4x1xf32>
    %20 = arith.mulf %7, %19 : vector<1x4x1xf32>
    %21 = arith.subf %18, %20 : vector<1x4x1xf32>
    %22 = vector.broadcast %19 : vector<1x4x1xf32> to vector<2x4x256xf32>
    %23 = arith.mulf %0, %22 : vector<2x4x256xf32>
    %24 = vector.broadcast %21 : vector<1x4x1xf32> to vector<2x4x256xf32>
    %25 = arith.addf %23, %24 : vector<2x4x256xf32>
    %cst_10 = arith.constant 0.000000e+00 : f32
    %26 = vector.broadcast %cst_10 : f32 to vector<2x4x256xf32>
    %27 = arith.maximumf %25, %26 : vector<2x4x256xf32>
    %c0_11 = arith.constant 0 : index
    %c0_12 = arith.constant 0 : index
    %c0_13 = arith.constant 0 : index
    %28 = vector.load %arg4[%c0_11, %c0_12, %c0_13] : memref<2x4x256xf32, #tpu.memory_space<vmem>>, vector<2x4x256xf32>
    tpu.vector_store %arg4[%c0_11, %c0_12, %c0_13], %27 {strides = array<i32>} : memref<2x4x256xf32, #tpu.memory_space<vmem>>, vector<2x4x256xf32>,
    return
  }
  func.func @transform_0(%arg0: i32) -> (i32, i32, i32) {
    %c0_i32 = arith.constant 0 : i32
    %c0_i32_0 = arith.constant 0 : i32
    %c0_i32_1 = arith.constant 0 : i32
    return %c0_i32, %arg0, %c0_i32_0 : i32, i32, i32
  }
  func.func @transform_1(%arg0: i32) -> (i32, i32) {
    %c0_i32 = arith.constant 0 : i32
    %c0_i32_0 = arith.constant 0 : i32
    return %arg0, %c0_i32 : i32, i32
  }
  func.func @transform_2(%arg0: i32) -> (i32, i32) {
    %c0_i32 = arith.constant 0 : i32
    %c0_i32_0 = arith.constant 0 : i32
    return %arg0, %c0_i32 : i32, i32
  }
  func.func @transform_3(%arg0: i32) -> (i32, i32, i32) {
    %c0_i32 = arith.constant 0 : i32
    %c0_i32_0 = arith.constant 0 : i32
    %c0_i32_1 = arith.constant 0 : i32
    return %c0_i32, %arg0, %c0_i32_0 : i32, i32, i32
  }
}

</mosaic_0001>

<bundles_post_ra>
// kernel: tpu_custom_call.1
= control target key start
LH: loop header
LB: loop body
LE: loop exit
PB: predicated region body
PF: predicated region fallthrough
CT: control target
= control target key end

     0   :  { %8 = vsyncpa [#allocation3], 0  ;;  %s271_s0 = inlined_call_operand.hbm [shape: f32[2,4,256], index: 0, kind: input, shape index: {}]   ;;  %s272_s1 = inlined_call_operand.vmem [shape: f32[4,1], index: 1, kind: input, shape index: {}]   ;;  %s273_s2 = inlined_call_operand.vmem [shape: f32[4,1], index: 2, kind: input, shape index: {}]   ;;  %s274_s3 = inlined_call_operand.hbm [shape: f32[2,4,256], index: 3, kind: output, shape index: {}]  }
   0x1   :  { %9 = vsyncpa [#allocation4], 0  ;;  %s14_s14 = sshll.u32 %s271_s0, 4  ;;  %s207_s15 = smov [#allocation2]   ;;  %s15_s14 = int_to_ptr.hbm [resolvable:$true] %s14_s14 }
   0x2   :  { %s16_s16 = sshll.u32 %s207_s15, 4  ;;  %s208_s17 = smov 128   ;;  %s17_s16 = int_to_ptr.vmem [resolvable:$true] %s16_s16 }
   0x3   :  { %s209_s18 = smov 8  }
   0x4   :  { %22 = dma.hbm_to_vmem [thread:$0]  %s15_s14, 256, %s17_s16, [#allocation3], %s208_s17, %s208_s17, %s209_s18  }
   0x5   :  { %203 = dma.done.wait [#allocation3], 256  }
   0x6   :  { %204 = vsyncadd [#allocation3], 4294967040  ;;  %v239_v0 = vld [vmem:[#allocation2] sm:$0xff]  ;;  %v241_v1 = vld [vmem:[#allocation2 + $0x8] sm:$0xff]  ;;  %vm46_vm0 = vcmask 1043456   ;;  %v210_v26 = vmov 0  }
   0x7   :  { %35 = vst [vmem:[#allocation1] ss:$2 sm:$0xff] %v239_v0  ;;  %v56_v2 = vmul.f32 %v239_v0, %v239_v0  ;;  %v57_v3 = vmul.f32 %v241_v1, %v241_v1  ;;  %151 = vset.pattern.permute.xlu1 %v210_v26  ;;  %152 = vset.pattern.permute.xlu0 %v210_v26  ;;  %v95_v40 = vld [vmem:[%s272_s1] sm:$0xf]  ;;  %v211_v46 = vmov 839922192  }
   0x8   :  { %39 = vst [vmem:[#allocation1 + $0x10] ss:$2 sm:$0xff] %v241_v1  ;;  %v96_v44 = vld [vmem:[%s273_s2] sm:$0xf]  ;;  %v105_v47 = vunpack.c.l.s4 %v211_v46  ;;  %s212_s1 = smov [#allocation5]   ;;  %s132_s2 = sshll.u32 %s274_s3, 4  ;;  %s133_s2 = int_to_ptr.hbm [resolvable:$true] %s132_s2 }
   0x9   :  { %s130_s22 = sshll.u32 %s212_s1, 4  ;;  %s131_s22 = int_to_ptr.vmem [resolvable:$true] %s130_s22 }
   0xa   :  { %v106_v49 = vunpack.c.0.s8 %v105_v47 }
   0xe   :  { %v36_v4 = vld.sshfl [vmem:[#allocation1] sm:$0xff pattern:$0x75316420]  ;;  %v37_v5 = vld.sshfl [vmem:[#allocation1 + $0x8] sm:$0xff pattern:$0x75316420] }
   0xf   :  { %v40_v6 = vld.sshfl [vmem:[#allocation1 + $0x10] sm:$0xff pattern:$0x75316420]  ;;  %v41_v7 = vld.sshfl [vmem:[#allocation1 + $0x18] sm:$0xff pattern:$0x75316420] }
  0x10   :  { %v47_v8 = vsel %vm46_vm0, %v36_v4, 0.0  ;;  %v48_v9 = vsel %vm46_vm0, %v37_v5, 0.0  ;;  %v50_v10 = vsel %vm46_vm0, %v40_v6, 0.0  ;;  %60 = vst [vmem:[#allocation1] ss:$2 sm:$0xff] %v56_v2  ;;  %v52_v12 = vsel %vm46_vm0, %v41_v7, 0.0 }
  0x11   :  { %v49_v11 = vadd.f32 %v48_v9, %v47_v8  ;;  %64 = vst [vmem:[#allocation1 + $0x10] ss:$2 sm:$0xff] %v57_v3 }
  0x13   :  { %v51_v13 = vadd.f32 %v50_v10, %v49_v11 }
  0x15   :  { %v53_v14 = vadd.f32 %v52_v12, %v51_v13 }
  0x17   :  { %54 = vadd.xlane.f32.xlu0 %v53_v14  ;;  %v61_v15 = vld.sshfl [vmem:[#allocation1] sm:$0xff pattern:$0x75316420]  ;;  %v62_v16 = vld.sshfl [vmem:[#allocation1 + $0x8] sm:$0xff pattern:$0x75316420] }
  0x18   :  { %v65_v17 = vld.sshfl [vmem:[#allocation1 + $0x10] sm:$0xff pattern:$0x75316420]  ;;  %v66_v18 = vld.sshfl [vmem:[#allocation1 + $0x18] sm:$0xff pattern:$0x75316420] }
  0x19   :  { %v71_v19 = vsel %vm46_vm0, %v61_v15, 0.0  ;;  %v72_v20 = vsel %vm46_vm0, %v62_v16, 0.0  ;;  %v74_v21 = vsel %vm46_vm0, %v65_v17, 0.0  ;;  %v76_v23 = vsel %vm46_vm0, %v66_v18, 0.0 }
  0x1a   :  { %v73_v22 = vadd.f32 %v72_v20, %v71_v19 }
  0x1c   :  { %v75_v24 = vadd.f32 %v74_v21, %v73_v22 }
  0x1e   :  { %v77_v25 = vadd.f32 %v76_v23, %v75_v24 }
  0x20   :  { %78 = vadd.xlane.f32.xlu0 %v77_v25 }
  0x8a   :  { %v55_v27 = vpop.xlane.xlu0 %54 }
  0x8b   :  { %v80_v28 = vmul.f32 0.001953125, %v55_v27 }
  0x8d   :  { %v82_v30 = vmul.f32 %v80_v28, %v80_v28 }
  0x93   :  { %v79_v29 = vpop.xlane.xlu0 %78 }
  0x94   :  { %v81_v31 = vmul.f32 0.001953125, %v79_v29 }
  0x96   :  { %v83_v32 = vsub.f32 %v81_v31, %v82_v30 }
  0x98   :  { %v84_v33 = vadd.f32 1e-05, %v83_v32 }
  0x9a   :  { %153 = vrsqrt.f32 %v84_v33  ;;  %vm91_vm2 = vweird.f32 %v84_v33 }
  0xa0   :  { %v154_v34 = vpop.eup %153 }
  0xa1   :  { %v86_v35 = vmul.f32 %v154_v34, %v84_v33  ;;  %vm92_vm1 = vweird.f32 %v154_v34 }
  0xa2   :  { %vm93_vm3 = vmor %vm91_vm2, %vm92_vm1 }
  0xa3   :  { %v87_v36 = vmul.f32 %v154_v34, %v86_v35 }
  0xa5   :  { %v88_v37 = vmul.f32 0.5, %v87_v36 }
  0xa7   :  { %v89_v38 = vsub.f32 1.5, %v88_v37 }
  0xa9   :  { %v90_v39 = vmul.f32 %v154_v34, %v89_v38 }
  0xab   :  { %v94_v41 = vsel %vm93_vm3, %v154_v34, %v90_v39 }
  0xac   :  { %v97_v42 = vmul.f32 %v95_v40, %v94_v41 }
  0xae   :  { %102 = vperm.xlu1 %151, %v97_v42   ;;  %v98_v43 = vmul.f32 %v97_v42, %v80_v28 }
  0xb0   :  { %v99_v45 = vsub.f32 %v96_v44, %v98_v43 }
  0xb6   :  { %113 = vperm.xlu1 %151, %v99_v45  }
 0x120   :  { %v103_v48 = vpop.permute.xlu1 %102 }
 0x121   :  { %v107_v50 = vperm.slane %v103_v48, %v106_v49 }
 0x123   :  { %v109_v52 = vmul.f32 %v107_v50, %v239_v0  ;;  %v110_v53 = vmul.f32 %v107_v50, %v241_v1 }
 0x128   :  { %v114_v51 = vpop.permute.xlu1 %113 }
 0x129   :  { %v118_v54 = vperm.slane %v114_v51, %v106_v49 }
 0x12b   :  { %v120_v55 = vadd.f32 %v118_v54, %v109_v52  ;;  %v121_v56 = vadd.f32 %v118_v54, %v110_v53 }
 0x12d   :  { %v122_v57 = vmax.f32 %v120_v55, 0.0  ;;  %v123_v58 = vmax.f32 %v121_v56, 0.0 }
 0x12f   :  { %124 = vst [vmem:[#allocation5] sm:$0xff] %v122_v57 }
 0x130   :  { %125 = vst [vmem:[#allocation5 + $0x8] sm:$0xff] %v123_v58 }
 0x131   :  { %138 = dma.vmem_to_hbm [thread:$0]  %s131_s22, 256, %s133_s2, [#allocation4], %s208_s17, %s208_s17, %s209_s18  }
 0x132   :  { %205 = dma.done.wait [#allocation4], 256  }
 0x133   :  { %206 = vsyncadd [#allocation4], 4294967040 }
 0x134   :  { %143 = vsyncpa [#allocation3], 1 }
 0x135   :  { %144 = vsyncpa [#allocation4], 1 }

</bundles_post_ra>
